<compile_context>
chip_gen: v7x
topology: tpu7x:2x2x1
jax: 0.10.0
libtpu: 0.0.40
codegen_flags: <defaults>
</compile_context>

<pallas_src>
import functools

import jax
import jax.numpy as jnp
from jax import lax
from jax.experimental import pallas as pl
from jax.experimental.pallas import tpu as pltpu


# ---------------------------------------------------------------------------
# Per-generation tuning (v5e/v6e: 128 MiB physical VMEM; v7x: 64 MiB).
# ---------------------------------------------------------------------------

def _tpu_generation():
    try:
        kind = jax.devices()[0].device_kind.lower()
    except Exception:
        return 7                    # unknown -> most conservative VMEM budget
    for g in (7, 6, 5, 4):
        if ("v%d" % g) in kind or ("tpu%d" % g) in kind:
            return g
    return 7


def _gen_params():
    gen = _tpu_generation()
    if gen >= 7:
        vmem_limit = 44 * 1024 * 1024        # stay well under 64 MiB physical
        max_block_bytes = 4 * 1024 * 1024    # 4x (in+out double-buffer) << limit
    else:
        vmem_limit = 96 * 1024 * 1024        # of 128 MiB physical on v5e/v6e
        max_block_bytes = 8 * 1024 * 1024
    # Fused path budget: 2x in + 2x out pipeline buffers plus a couple of
    # block-sized elementwise intermediates inside the kernel body (~8 slabs).
    fused_gate = vmem_limit // 8
    return gen, vmem_limit, max_block_bytes, fused_gate


# ---------------------------------------------------------------------------
# Kernels
# ---------------------------------------------------------------------------

def _fused_kernel(x_ref, w1_ref, b1_ref, w2_ref, b2_ref, o_ref, *, inv_hw):
    """Single-pass CALayer for one VMEM-resident image: pool + MLP + scale.

    x_ref/o_ref: (C, HW).  Reads x from HBM exactly once (1R + 1W traffic).
    """
    xf = x_ref[...].astype(jnp.float32)                         # (C, HW)
    y = jnp.sum(xf, axis=1, keepdims=True) * inv_hw             # (C, 1) mean
    # conv_du[0]: C -> C//r (+bias), ReLU.  Column-shaped, no transposes.
    z = jnp.dot(w1_ref[...], y, preferred_element_type=jnp.float32) + b1_ref[...]
    z = jnp.maximum(z, 0.0)                                     # (Cr, 1)
    # conv_du[2]: C//r -> C (+bias), Sigmoid.
    s = jnp.dot(w2_ref[...], z, preferred_element_type=jnp.float32) + b2_ref[...]
    s = jax.nn.sigmoid(s)                                       # (C, 1)
    o_ref[...] = (xf * s).astype(o_ref.dtype)


def _pool_kernel(x_ref, psum_ref, acc_ref, *, hw, tile, t_per_chunk, ragged):
    """Phase 1: per-(image, chunk) spatial partial sum.

    Grid: (N, n_chunks, t_per_chunk) with the last axis 'arbitrary'.
    acc_ref: (C, 128) f32 scratch — the cross-lane (XLU) reduce is deferred to
    the chunk finalize; the per-tile inner loop is pure VALU adds + DMA.
    """
    k = pl.program_id(2)

    @pl.when(k == 0)
    def _init():
        acc_ref[...] = jnp.zeros_like(acc_ref)

    x = x_ref[...].astype(jnp.float32)                          # (C, tile)
    if ragged:
        # Mask lanes past the true spatial extent (last block is partial).
        c = pl.program_id(1)
        g0 = (c * t_per_chunk + k) * tile
        lane = lax.broadcasted_iota(jnp.int32, x.shape, 1)
        x = jnp.where(g0 + lane < hw, x, 0.0)

    n_full = tile // 128
    if n_full >= 1:
        # Tree-add the 128-lane slices (vreg-aligned -> pure VALU, no XLU).
        parts = [x[:, i * 128:(i + 1) * 128] for i in range(n_full)]
        while len(parts) > 1:
            nxt = [a + b for a, b in zip(parts[0::2], parts[1::2])]
            if len(parts) % 2:
                nxt.append(parts[-1])
            parts = nxt
        acc_ref[...] += parts[0]
    rem = tile - n_full * 128
    if rem:
        acc_ref[:, 0:1] += jnp.sum(x[:, n_full * 128:], axis=1, keepdims=True)

    @pl.when(k == pl.num_programs(2) - 1)
    def _finalize():
        # Single deferred XLU reduce per (image, chunk).
        psum_ref[...] = jnp.sum(acc_ref[...], axis=1, keepdims=True)


def _scale_kernel(x_ref, s_ref, o_ref):
    """Phase 2: out = x * s.  Per-channel (sublane) scale broadcast across the
    spatial (lane) axis.  The multiply dtype is chosen by the wrapper via the
    dtype of s (bf16 fast path on v6e/v7x, f32 otherwise)."""
    s = s_ref[...]                                              # (C, 1)
    o_ref[...] = (x_ref[...].astype(s.dtype) * s).astype(o_ref.dtype)


# ---------------------------------------------------------------------------
# Tiling
# ---------------------------------------------------------------------------

def _choose_hw_tile(hw, c, itemsize, max_block_bytes):
    """HW tile: full extent if it fits the block budget; otherwise the largest
    128-multiple within budget, preferring an exact divisor of HW (ragged
    tails are handled in-kernel with a lane mask / masked writeback)."""
    if c * hw * itemsize <= max_block_bytes:
        return hw
    max_t = max(128, (max_block_bytes // max(1, c * itemsize)) // 128 * 128)
    t = max_t
    while t >= 128:
        if hw % t == 0:
            return t
        t -= 128
    return max_t          # no 128-multiple divisor: ragged grid + in-kernel mask


# ---------------------------------------------------------------------------
# Forward
# ---------------------------------------------------------------------------

def ca_layer(x, w1, b1, w2, b2, *, force_two_phase=False, max_block_bytes=None):
    """CALayer forward.

    x: (N, C, H, W); w1: (Cr, C), b1: (Cr,), w2: (C, Cr), b2: (C,)
    (1x1 Conv2d weights squeezed to 2-D).  Returns (N, C, H, W).
    """
    N, C, H, W = x.shape
    Cr = w1.shape[0]
    HW = H * W
    inv_hw = 1.0 / float(HW)

    gen, vmem_limit, default_block_bytes, fused_gate = _gen_params()
    if max_block_bytes is None:
        max_block_bytes = default_block_bytes

    x3 = x.reshape(N, C, HW)                       # free: contiguous NCHW view
    w1f = w1.astype(jnp.float32)                   # (Cr, C)
    w2f = w2.astype(jnp.float32)                   # (C, Cr)

    slab_bytes = C * HW * x.dtype.itemsize

    # ---------------- Fused single-pass path (1R + 1W HBM traffic) ----------
    if (not force_two_phase) and slab_bytes <= fused_gate:
        b1c = b1.astype(jnp.float32).reshape(Cr, 1)
        b2c = b2.astype(jnp.float32).reshape(C, 1)
        out3 = pl.pallas_call(
            functools.partial(_fused_kernel, inv_hw=inv_hw),
            out_shape=jax.ShapeDtypeStruct((N, C, HW), x.dtype),
            grid_spec=pltpu.PrefetchScalarGridSpec(
                num_scalar_prefetch=0,
                grid=(N,),
                in_specs=[
                    pl.BlockSpec((pl.Squeezed(), C, HW), lambda n: (n, 0, 0)),
                    pl.BlockSpec((Cr, C), lambda n: (0, 0)),
                    pl.BlockSpec((Cr, 1), lambda n: (0, 0)),
                    pl.BlockSpec((C, Cr), lambda n: (0, 0)),
                    pl.BlockSpec((C, 1), lambda n: (0, 0)),
                ],
                out_specs=pl.BlockSpec((pl.Squeezed(), C, HW), lambda n: (n, 0, 0)),
            ),
            compiler_params=pltpu.CompilerParams(
                dimension_semantics=("parallel",),
                vmem_limit_bytes=vmem_limit,
            ),
        )(x3, w1f, b1c, w2f, b2c)
        return out3.reshape(N, C, H, W)

    # ---------------- Two-phase streaming path -------------------------------
    T = _choose_hw_tile(HW, C, x.dtype.itemsize, max_block_bytes)
    n_t = (HW + T - 1) // T
    # At N == 1 give phase 1 a second 'parallel' axis (HW chunks) so both
    # v7x TensorCores share the memory-bound pool pass.
    n_chunks = 2 if (N == 1 and n_t >= 2 and n_t % 2 == 0) else 1
    t_per_chunk = n_t // n_chunks
    ragged = (n_t * T) != HW

    x_pipeline_mode = pl.Buffered(3) if t_per_chunk >= 3 else None

    # Phase 1: per-chunk partial spatial sums -> (N, n_chunks, C, 1) f32.
    psum = pl.pallas_call(
        functools.partial(_pool_kernel, hw=HW, tile=T,
                          t_per_chunk=t_per_chunk, ragged=ragged),
        out_shape=jax.ShapeDtypeStruct((N, n_chunks, C, 1), jnp.float32),
        grid_spec=pltpu.PrefetchScalarGridSpec(
            num_scalar_prefetch=0,
            grid=(N, n_chunks, t_per_chunk),
            in_specs=[
                pl.BlockSpec((pl.Squeezed(), C, T),
                             lambda n, c, k: (n, 0, c * t_per_chunk + k),
                             pipeline_mode=x_pipeline_mode),
            ],
            out_specs=pl.BlockSpec((pl.Squeezed(), pl.Squeezed(), C, 1),
                                   lambda n, c, k: (n, c, 0, 0)),
            scratch_shapes=[pltpu.VMEM((C, 128), jnp.float32)],
        ),
        compiler_params=pltpu.CompilerParams(
            dimension_semantics=("parallel", "parallel", "arbitrary"),
            vmem_limit_bytes=vmem_limit,
        ),
    )(x3)

    # Tiny squeeze/excite MLP (O(N*C*C/r)) in plain JAX — negligible next to
    # the memory-bound streaming passes.
    mean = psum.sum(axis=(1, 3)) * inv_hw                              # (N, C)
    z = jnp.maximum(mean @ w1f.T + b1.astype(jnp.float32), 0.0)        # (N, Cr)
    s2 = jax.nn.sigmoid(z @ w2f.T + b2.astype(jnp.float32))            # (N, C)

    # bf16 multiply path on v6e/v7x (bf16 VALU); f32 path on v5e / f32 inputs.
    use_low_prec_mul = (x.dtype == jnp.bfloat16) and gen >= 6
    s3 = s2[:, :, None].astype(x.dtype if use_low_prec_mul else jnp.float32)

    # Phase 2: out = x * s, streamed over HW tiles (both axes megacore-parallel).
    out3 = pl.pallas_call(
        _scale_kernel,
        out_shape=jax.ShapeDtypeStruct((N, C, HW), x.dtype),
        grid_spec=pltpu.PrefetchScalarGridSpec(
            num_scalar_prefetch=0,
            grid=(N, n_t),
            in_specs=[
                pl.BlockSpec((pl.Squeezed(), C, T), lambda n, t: (n, 0, t)),
                pl.BlockSpec((pl.Squeezed(), C, 1), lambda n, t: (n, 0, 0)),
            ],
            out_specs=pl.BlockSpec((pl.Squeezed(), C, T), lambda n, t: (n, 0, t)),
        ),
        compiler_params=pltpu.CompilerParams(
            dimension_semantics=("parallel", "parallel"),
            vmem_limit_bytes=vmem_limit,
        ),
    )(x3, s3)

    return out3.reshape(N, C, H, W)


def ca_layer_ref(x, w1, b1, w2, b2):
    """Pure-JAX reference matching the PyTorch module (f32 math)."""
    xf = x.astype(jnp.float32)
    y = jnp.mean(xf, axis=(2, 3))                          # (N, C)
    z = jnp.maximum(y @ w1.T + b1, 0.0)                    # (N, Cr)
    s = jax.nn.sigmoid(z @ w2.T + b2)                      # (N, C)
    return xf * s[:, :, None, None]


if __name__ == "__main__":
    def make_inputs(key, n, c, cr, h, w, dtype):
        kx, k1, k2, k3, k4 = jax.random.split(key, 5)
        x = jax.random.normal(kx, (n, c, h, w), dtype=jnp.float32).astype(dtype)
        w1 = jax.random.normal(k1, (cr, c), dtype=jnp.float32) * 0.1   # conv_du[0].weight
        b1 = jax.random.normal(k2, (cr,), dtype=jnp.float32) * 0.1     # conv_du[0].bias
        w2 = jax.random.normal(k3, (c, cr), dtype=jnp.float32) * 0.1   # conv_du[2].weight
        b2 = jax.random.normal(k4, (c,), dtype=jnp.float32) * 0.1      # conv_du[2].bias
        return x, w1, b1, w2, b2

    key = jax.random.PRNGKey(0)
    ka, kb, kc = jax.random.split(key, 3)

    # Test 1: CALayer(channel=32, reduction=4), fused single-pass path.
    x, w1, b1, w2, b2 = make_inputs(ka, 2, 32, 8, 16, 16, jnp.float32)
    out = jax.block_until_ready(ca_layer(x, w1, b1, w2, b2))
    ref = jax.block_until_ready(ca_layer_ref(x, w1, b1, w2, b2))
    assert out.shape == (2, 32, 16, 16) and out.dtype == x.dtype
    assert jnp.allclose(out, ref, atol=1e-5, rtol=1e-5)

    # Test 2: forced two-phase streaming path with a ragged spatial size
    # (HW=250, no 128-multiple divisor) and the N==1 chunk-parallel pool grid.
    x, w1, b1, w2, b2 = make_inputs(kb, 1, 16, 4, 10, 25, jnp.float32)
    out = jax.block_until_ready(
        ca_layer(x, w1, b1, w2, b2, force_two_phase=True,
                 max_block_bytes=16 * 128 * 4))
    ref = ca_layer_ref(x, w1, b1, w2, b2)
    assert jnp.allclose(out, ref, atol=1e-5, rtol=1e-5)

    # Test 3: forced two-phase streaming path in bf16 (bf16 multiply path on
    # v6e/v7x, f32 multiply on v5e); looser tolerance for bf16 rounding.
    x, w1, b1, w2, b2 = make_inputs(kc, 2, 32, 8, 16, 24, jnp.bfloat16)
    out = jax.block_until_ready(
        ca_layer(x, w1, b1, w2, b2, force_two_phase=True,
                 max_block_bytes=32 * 128 * 2))
    ref = ca_layer_ref(x, w1, b1, w2, b2)
    assert jnp.allclose(out.astype(jnp.float32), ref.astype(jnp.float32),
                        atol=3e-2, rtol=3e-2)

    print("KERNEL_OK")
</pallas_src>

<mosaic_0001>
module attributes {stable_mosaic.version = 11 : i64} {
  func.func @_fused_kernel(%arg0: i32, %arg1: memref<1x32x256xf32, #tpu.memory_space<vmem>>, %arg2: memref<8x32xf32, #tpu.memory_space<vmem>>, %arg3: memref<8x1xf32, #tpu.memory_space<vmem>>, %arg4: memref<32x8xf32, #tpu.memory_space<vmem>>, %arg5: memref<32x1xf32, #tpu.memory_space<vmem>>, %arg6: memref<1x32x256xf32, #tpu.memory_space<vmem>>) attributes {dimension_semantics = [#tpu.dimension_semantics<parallel>], iteration_bounds = array<i64: 2>, scalar_prefetch = 0 : i64, scratch_operands = 0 : i64, tpu.core_type = #tpu.core_type<tc>, window_params = [{transform_indices = @transform_0, window_bounds = array<i64: 1, 32, 256>}, {pipeline_mode = #tpu.pipeline_mode<synchronous>, transform_indices = @transform_1, window_bounds = array<i64: 8, 32>}, {pipeline_mode = #tpu.pipeline_mode<synchronous>, transform_indices = @transform_2, window_bounds = array<i64: 8, 1>}, {pipeline_mode = #tpu.pipeline_mode<synchronous>, transform_indices = @transform_3, window_bounds = array<i64: 32, 8>}, {pipeline_mode = #tpu.pipeline_mode<synchronous>, transform_indices = @transform_4, window_bounds = array<i64: 32, 1>}, {transform_indices = @transform_5, window_bounds = array<i64: 1, 32, 256>}]} {
    %c0 = arith.constant 0 : index
    %c0_0 = arith.constant 0 : index
    %c0_1 = arith.constant 0 : index
    %0 = vector.load %arg1[%c0, %c0_0, %c0_1] : memref<1x32x256xf32, #tpu.memory_space<vmem>>, vector<1x32x256xf32>
    %1 = vector.shape_cast %0 : vector<1x32x256xf32> to vector<32x256xf32>
    %cst = arith.constant dense<0.000000e+00> : vector<32xf32>
    %2 = vector.multi_reduction <add>, %1, %cst [1] : vector<32x256xf32> to vector<32xf32>
    %3 = vector.shape_cast %2 : vector<32xf32> to vector<32x1xf32>
    %cst_2 = arith.constant 3.906250e-03 : f32
    %4 = vector.broadcast %cst_2 : f32 to vector<32x1xf32>
    %5 = arith.mulf %3, %4 : vector<32x1xf32>
    %c0_3 = arith.constant 0 : index
    %c0_4 = arith.constant 0 : index
    %6 = vector.load %arg2[%c0_3, %c0_4] : memref<8x32xf32, #tpu.memory_space<vmem>>, vector<8x32xf32>
    %cst_5 = arith.constant dense<0.000000e+00> : vector<8x1xf32>
    %7 = tpu.matmul %6, %5, %cst_5 {dimension_numbers = #tpu.dot_dimension_numbers<[1], [0], [0], [1], [0, 0, 1, 1], [], []>} : vector<8x32xf32>, vector<32x1xf32>, vector<8x1xf32> -> vector<8x1xf32>
    %c0_6 = arith.constant 0 : index
    %c0_7 = arith.constant 0 : index
    %8 = vector.load %arg3[%c0_6, %c0_7] : memref<8x1xf32, #tpu.memory_space<vmem>>, vector<8x1xf32>
    %9 = arith.addf %7, %8 : vector<8x1xf32>
    %cst_8 = arith.constant 0.000000e+00 : f32
    %10 = vector.broadcast %cst_8 : f32 to vector<8x1xf32>
    %11 = arith.maximumf %9, %10 : vector<8x1xf32>
    %c0_9 = arith.constant 0 : index
    %c0_10 = arith.constant 0 : index
    %12 = vector.load %arg4[%c0_9, %c0_10] : memref<32x8xf32, #tpu.memory_space<vmem>>, vector<32x8xf32>
    %cst_11 = arith.constant dense<0.000000e+00> : vector<32x1xf32>
    %13 = tpu.matmul %12, %11, %cst_11 {dimension_numbers = #tpu.dot_dimension_numbers<[1], [0], [0], [1], [0, 0, 1, 1], [], []>} : vector<32x8xf32>, vector<8x1xf32>, vector<32x1xf32> -> vector<32x1xf32>
    %c0_12 = arith.constant 0 : index
    %c0_13 = arith.constant 0 : index
    %14 = vector.load %arg5[%c0_12, %c0_13] : memref<32x1xf32, #tpu.memory_space<vmem>>, vector<32x1xf32>
    %15 = arith.addf %13, %14 : vector<32x1xf32>
    %16 = arith.negf %15 : vector<32x1xf32>
    %17 = math.exp %16 : vector<32x1xf32>
    %cst_14 = arith.constant 1.000000e+00 : f32
    %18 = vector.broadcast %cst_14 : f32 to vector<32x1xf32>
    %19 = arith.addf %18, %17 : vector<32x1xf32>
    %20 = arith.divf %18, %19 : vector<32x1xf32>
    %21 = vector.broadcast %20 : vector<32x1xf32> to vector<32x256xf32>
    %22 = arith.mulf %1, %21 : vector<32x256xf32>
    %c0_15 = arith.constant 0 : index
    %c0_16 = arith.constant 0 : index
    %c0_17 = arith.constant 0 : index
    %23 = vector.load %arg6[%c0_15, %c0_16, %c0_17] : memref<1x32x256xf32, #tpu.memory_space<vmem>>, vector<1x32x256xf32>
    %24 = vector.shape_cast %23 : vector<1x32x256xf32> to vector<32x256xf32>
    %25 = vector.shape_cast %22 : vector<32x256xf32> to vector<1x32x256xf32>
    tpu.vector_store %arg6[%c0_15, %c0_16, %c0_17], %25 {strides = array<i32>} : memref<1x32x256xf32, #tpu.memory_space<vmem>>, vector<1x32x256xf32>,
    return
  }
  func.func @transform_0(%arg0: i32) -> (i32, i32, i32) {
    %c0_i32 = arith.constant 0 : i32
    %c0_i32_0 = arith.constant 0 : i32
    %c0_i32_1 = arith.constant 0 : i32
    return %arg0, %c0_i32, %c0_i32_0 : i32, i32, i32
  }
  func.func @transform_1(%arg0: i32) -> (i32, i32) {
    %c0_i32 = arith.constant 0 : i32
    %c0_i32_0 = arith.constant 0 : i32
    %c0_i32_1 = arith.constant 0 : i32
    return %c0_i32, %c0_i32_0 : i32, i32
  }
  func.func @transform_2(%arg0: i32) -> (i32, i32) {
    %c0_i32 = arith.constant 0 : i32
    %c0_i32_0 = arith.constant 0 : i32
    %c0_i32_1 = arith.constant 0 : i32
    return %c0_i32, %c0_i32_0 : i32, i32
  }
  func.func @transform_3(%arg0: i32) -> (i32, i32) {
    %c0_i32 = arith.constant 0 : i32
    %c0_i32_0 = arith.constant 0 : i32
    %c0_i32_1 = arith.constant 0 : i32
    return %c0_i32, %c0_i32_0 : i32, i32
  }
  func.func @transform_4(%arg0: i32) -> (i32, i32) {
    %c0_i32 = arith.constant 0 : i32
    %c0_i32_0 = arith.constant 0 : i32
    %c0_i32_1 = arith.constant 0 : i32
    return %c0_i32, %c0_i32_0 : i32, i32
  }
  func.func @transform_5(%arg0: i32) -> (i32, i32, i32) {
    %c0_i32 = arith.constant 0 : i32
    %c0_i32_0 = arith.constant 0 : i32
    %c0_i32_1 = arith.constant 0 : i32
    return %arg0, %c0_i32, %c0_i32_0 : i32, i32, i32
  }
}

</mosaic_0001>

<bundles_post_ra>
// kernel: tpu_custom_call.1
= control target key start
LH: loop header
LB: loop body
LE: loop exit
PB: predicated region body
PF: predicated region fallthrough
CT: control target
= control target key end

     0   :  { %10 = vsyncpa [#allocation3], 0  ;;  %s1095_s0 = inlined_call_operand.hbm [shape: f32[2,32,256], index: 0, kind: input, shape index: {}]   ;;  %s1096_s1 = inlined_call_operand.vmem [shape: f32[8,32], index: 1, kind: input, shape index: {}]   ;;  %s1097_s2 = inlined_call_operand.vmem [shape: f32[8,1], index: 2, kind: input, shape index: {}]   ;;  %s1098_s3 = inlined_call_operand.vmem [shape: f32[32,8], index: 3, kind: input, shape index: {}]   ;;  %s1099_s4 = inlined_call_operand.vmem [shape: f32[32,1], index: 4, kind: input, shape index: {}]   ;;  %s1100_s5 = inlined_call_operand.hbm [shape: f32[2,32,256], index: 5, kind: output, shape index: {}]  }
   0x1   :  { %12 = vsyncpa [#allocation3 + $0x1], 0 }
   0x2   :  { %13 = vsyncpa [#allocation4], 0 }
   0x3   :  { %15 = vsyncpa [#allocation4 + $0x1], 0  ;;  %s867_s18 = smov 0   ;;  %s869_s19 = smov 0  }
   0x4   :  { %s871_s20 = smov 0   ;;  %s873_s21 = smov 0  }
   0x5 LB: > { %s888_s22 = sadd.s32 4294967295, %s825_s21   ;;  %s597_s23 = sadd.s32 4294967294, %s825_s21   ;;  %s825_s21 = sphi %s873_s21, %s1113_s21   ;;  %s821_s20 = sphi %s871_s20, %s1112_s20   ;;  %s817_s19 = sphi %s869_s19, %s1111_s19   ;;  %s813_s18 = sphi %s867_s18, %s1110_s18  }
   0x6   : > { %s892_s24 = sadd.s32 1, %s825_s21   ;;  %s28_s25 = sadd.s32 1, %s821_s20 }
   0x7   : > { %s25_s26 = ssub.s32 %s825_s21, %s892_s24  ;;  %p35_p0 = scmp.ne.s32.totalorder %s821_s20, %s817_s19 }
   0x8   : > { %p26_p1 = scmp.eq.s32.totalorder %s25_s26, 0  ;;  %p36_p2 = scmp.eq.s32.totalorder %s825_s21, 0 }
   0x9   : > { %p41_p3 = scmp.ne.s32.totalorder %s817_s19, %s813_s18  ;;  %p42_p4 = scmp.eq.s32.totalorder %s888_s22, 0 }
   0xa   : > { %s904_s27 = scalar_select %p26_p1, %s821_s20, %s28_s25  }
   0xb   : > { %p906_p5 = por %p36_p2, %p35_p0  ;;  %p910_p6 = por %p42_p4, %p41_p3 }
   0xc   : > { %p149_p7 = scmp.eq.s32.totalorder %s888_s22, 1  ;;  %p155_p8 = scmp.eq.s32.totalorder %s597_s23, 1 }
   0xd   : > { %p669_p10 = scmp.lt.s32.totalorder %s825_s21, 2  ;;  %s187_s7 = sand.u32 1, %s821_s20  }
   0xe   : > { %p917_p11 = por %p149_p7, %p35_p0  ;;  %p921_p12 = por %p155_p8, %p41_p3 }
   0xf   : > { %s620_s8 = sshll.u32 %s825_s21, 10  ;;  %s600_s9 = sshll.u32 %s187_s7, 6 }
  0x10   : > { %s1104_s30 = scalar_select %p917_p11, 1, 0 }
  0x11   : > { %s1105_s6 = scalar_select %p921_p12, 1, 0 }
  0x12   : > { %s930_s12 = scalar_lea.hbm %s1095_s0, %s620_s8  ;;  %s191_s13 = scalar_lea.vmem [#allocation2], %s600_s9 }
  0x13   : > { %s198_s14 = sshll.u32 %s191_s13, 4  ;;  %p934_p13 = pnand %p669_p10, %p906_p5  ;;  %s938_s14 = int_to_ptr.vmem [resolvable:$true] %s198_s14 }
  0x14   : > { %s940_s16 = scalar_lea.sflag [#allocation3], %s187_s7  ;;  %s729_s17 = scalar_lea.hbm %s930_s12, 1024 }
  0x15   : > { %p730_p0 = scmp.ne.s32.totalorder %s930_s12, %s729_s17  ;;  %p731_p1 = pneg %p934_p13 }
  0x16   : > { %s734_s26 = scalar_lea.hbm %s1095_s0, 2048  ;;  %p735_p4 = scmp.lt.u32.totalorder %s930_s12, %s1095_s0 }
  0x17   : > { %p732_p2 = pnand %p731_p1, %p730_p0  ;;  %p736_p5 = scmp.lt.u32.totalorder %s734_s26, %s729_s17 }
  0x18   : > { %p738_p8 = scmp.lt.u32.totalorder %s729_s17, %s930_s12 }
  0x19   : > { %p733_p3 = pneg %p732_p2  ;;  %p737_p7 = por %p736_p5, %p735_p4 }
  0x1b   : > { %p739_p10 = por %p738_p8, %p737_p7 }
  0x1d   : > { %p740_p9 = pnand %p739_p10, %p733_p3 }
  0x1f   : > { %743 = shalt.err (!%p740_p9)
}
  0x20   : > { %s744_s7 = scalar_lea.vmem %s938_s14, 1024  ;;  %s827_s9 = smov [#allocation2]  }
  0x21   : > { %p745_p0 = scmp.ne.s32.totalorder %s938_s14, %s744_s7  ;;  %s749_s10 = sshll.u32 %s827_s9, 4  ;;  %s750_s10 = int_to_ptr.vmem [resolvable:$false] %s749_s10 }
  0x22   : > { %s751_s11 = scalar_lea.vmem %s750_s10, 2048  ;;  %p752_p11 = scmp.lt.s32.totalorder %s938_s14, %s750_s10 }
  0x23   : > { %p747_p2 = pnand %p745_p0, %p731_p1  ;;  %p753_p4 = scmp.lt.s32.totalorder %s751_s11, %s744_s7 }
  0x25   : > { %p748_p12 = pneg %p747_p2  ;;  %p754_p5 = por %p753_p4, %p752_p11 }
  0x27   : > { %p755_p7 = pnand %p754_p5, %p748_p12 }
  0x29   : > { %758 = shalt.err (!%p755_p7)
}
  0x2a   : > { %s828_s13 = smov 256   ;;  %s829_s17 = smov 16  }
  0x2b   : > { %664 = dma.hbm_to_vmem [thread:$0]  (!%p934_p13), %s930_s12, 1024, %s938_s14, %s940_s16, %s828_s13, %s828_s13, %s829_s17  }
  0x2c   : > { %p603_p9 = scmp.ge.s32.totalorder %s825_s21, 1  ;;  %p206_p1 = scmp.lt.s32.totalorder %s825_s21, 3 }
  0x2e   : > { %p207_p3 = pnand %p603_p9, %p206_p1 }
  0x2f   : > { %s971_s23 = sand.u32 (!%p207_p3), 1, %s817_s19  }
  0x30   : > { %210 = sbr.rel (%p207_p3) target bundleno = 829 (0x33d), region = 40  ;;  %s604_s25 = sshll.u32 (!%p207_p3), %s971_s23, 6 }
  0x31   : > { %s213_s26 = scalar_lea.sflag (!%p207_p3), [#allocation3], %s971_s23  ;;  %s216_s28 = scalar_lea.vmem (!%p207_p3), [#allocation2], %s604_s25 }
  0x37   : > { %804 = dma.done.wait (%p910_p6), %s213_s26, 1024  }
  0x38   : > { %806 = vsyncadd (%p910_p6), %s213_s26, 4294966272  ;;  %v981_v0 = vld [vmem:[%s216_s28 + $0x20] sm:$0xff]  ;;  %v983_v1 = vld [vmem:[%s216_s28 + $0x28] sm:$0xff]  ;;  %v830_v12 = vmov 0.0|0.0   ;;  %vm831_vm0 = vmmov 0   ;;  %v832_v13 = vmov 0.0  }
  0x39   : > { %v985_v2 = vld [vmem:[%s216_s28] sm:$0xff]  ;;  %v257_v3 = vadd.f32 %v983_v1, %v981_v0  ;;  %v989_v4 = vld [vmem:[%s216_s28 + $0x8] sm:$0xff]  ;;  %v991_v5 = vld [vmem:[%s216_s28 + $0x30] sm:$0xff]  ;;  %651 = vmatprep.subr.bf16.mxu0 %v830_v12  ;;  %640 = vmatprep.mubr.msk.f32.mxu0 %vm831_vm0, %v832_v13  ;;  %vm269_vm1 = vcmask 261120   ;;  %vm352_vm2 = vcmask 64512   ;;  %v833_v34 = vmov 0  }
  0x3a   : > { %v993_v6 = vld [vmem:[%s216_s28 + $0x38] sm:$0xff]  ;;  %v251_v7 = vadd.f32 %v989_v4, %v985_v2  ;;  %v997_v8 = vld [vmem:[%s216_s28 + $0x10] sm:$0xff]  ;;  %v267_v24 = vld [vmem:[%s1096_s1] sm:$0xff]  ;;  %712 = vset.pattern.permute.xlu1 %v833_v34  ;;  %711 = vset.pattern.permute.xlu0 %v833_v34  ;;  %s242_s7 = scalar_lea.vmem [#allocation5], %s604_s25  ;;  %s621_s10 = sshll.u32 %s888_s22, 10 }
  0x3b   : > { %v999_v9 = vld [vmem:[%s216_s28 + $0x18] sm:$0xff]  ;;  %258 = vadd.xlane.f32.xlu1 %v257_v3  ;;  %v260_v10 = vadd.f32 %v993_v6, %v991_v5  ;;  %v344_v25 = vld [vmem:[%s1098_s3] sm:$0xff]  ;;  %v345_v31 = vld [vmem:[%s1098_s3 + $0x8] sm:$0xff]  ;;  %s524_s9 = sshll.u32 %s242_s7, 4  ;;  %s1049_s13 = scalar_lea.hbm %s1100_s5, %s621_s10  ;;  %s1044_s9 = int_to_ptr.vmem [resolvable:$true] %s524_s9 }
  0x3c   : > { %252 = vadd.xlane.f32.xlu0 %v251_v7  ;;  %v254_v11 = vadd.f32 %v999_v9, %v997_v8  ;;  %645 = vmatprep.mubr.msk.f32.mxu1 %vm352_vm2, %v344_v25  ;;  %v268_v26 = vld [vmem:[%s1097_s2] sm:$0xff]  ;;  %v346_v32 = vld [vmem:[%s1098_s3 + $0x10] sm:$0xff]  ;;  %v347_v33 = vld [vmem:[%s1098_s3 + $0x18] sm:$0xff]  ;;  %s511_s22 = scalar_lea.sflag [#allocation4], %s971_s23  ;;  %s759_s17 = scalar_lea.vmem %s1044_s9, 1024 }
  0x3d   : > { %v349_v35 = vld [vmem:[%s1099_s4 + $0x8] sm:$0xff]  ;;  %v348_v36 = vld [vmem:[%s1099_s4] sm:$0xff]  ;;  %v351_v41 = vld [vmem:[%s1099_s4 + $0x18] sm:$0xff]  ;;  %p760_p6 = scmp.ne.s32.totalorder %s1044_s9, %s759_s17  ;;  %p1107_p11 = scmp.ne.s32.totalorder %s1104_s30, 0 }
  0x3e   : > { %v350_v43 = vld [vmem:[%s1099_s4 + $0x10] sm:$0xff]  ;;  %s834_s26 = smov [#allocation5]  }
  0x3f   : > { %261 = vadd.xlane.f32.xlu1 %v260_v10  ;;  %p761_p12 = pnand %p760_p6, %p1107_p11  ;;  %s763_s28 = sshll.u32 %s834_s26, 4  ;;  %s764_s28 = int_to_ptr.vmem [resolvable:$false] %s763_s28 }
  0x40   : > { %255 = vadd.xlane.f32.xlu0 %v254_v11  ;;  %s765_s29 = scalar_lea.vmem %s764_s28, 2048  ;;  %p766_p8 = scmp.lt.s32.totalorder %s1044_s9, %s764_s28 }
  0x41   : > { %p762_p13 = pneg %p761_p12  ;;  %p767_p10 = scmp.lt.s32.totalorder %s765_s29, %s759_s17 }
  0x43   : > { %p768_p0 = por %p767_p10, %p766_p8 }
  0x45   : > { %p769_p2 = pnand %p768_p0, %p762_p13 }
  0xc8   : > { %v259_v14 = vpop.xlane.xlu1 %258 }
  0xc9   : > { %v253_v15 = vpop.xlane.xlu0 %252  ;;  %v265_v20 = vmul.f32 0.00390625, %v259_v14 }
  0xca   : > { %v263_v18 = vmul.f32 0.00390625, %v253_v15 }
  0xcc   : > { %v262_v16 = vpop.xlane.xlu1 %261 }
  0xcd   : > { %v256_v17 = vpop.xlane.xlu0 %255  ;;  %v266_v21 = vmul.f32 0.00390625, %v262_v16 }
  0xce   : > { %v264_v19 = vmul.f32 0.00390625, %v256_v17 }
  0xcf   : > { %v655_v23 = vpack.c.bf16 %v266_v21, %v265_v20 }
  0xd0   : > { %v652_v22 = vpack.c.bf16 %v264_v19, %v263_v18 }
  0xd2   : > { %653 = vmatpush3.bf16.msra.mxu0 %v652_v22 }
  0xd3   : > { %654 = vmatprep.subr.bf16.mxu0 %v830_v12 }
  0xd6   : > { %656 = vmatpush3.bf16.msra.mxu0 %v655_v23 }
  0xd9   : > { %641 = vmatmul.mubr.msk.f32.vlgmr.msra.gmra.mrb[0].mxu0 %vm269_vm1, %v267_v24 }
 0x1ac   : > { %v339_v27 = vpop.f32.mrb[0].mxu0 }
 0x1ad   : > { %v340_v28 = vadd.f32 %v339_v27, %v268_v26  ;;  %v642_v29 = vpop.f32.mrb[1].mxu0 }
 0x1af   : > { %v343_v30 = vmax.f32 %v340_v28, 0.0 }
 0x1b1   : > { %643 = vmatprep.subr.mxu1 %v343_v30 }
 0x1b2   : > { %644 = vmatpush3.msra.mxu1 %v343_v30 }
 0x1b3   : > { %646 = vmatmul.mubr.msk.f32.vlgmr.msra.gmra.mrb[0].mxu1 %vm352_vm2, %v345_v31 }
 0x1b4   : > { %648 = vmatprep.mubr.msk.f32.mxu1 %vm352_vm2, %v346_v32 }
 0x1b7   : > { %649 = vmatmul.mubr.msk.f32.gmra.mrb[2].mxu1 %vm352_vm2, %v347_v33 }
 0x286   : > { %v647_v37 = vpop.f32.mrb[0].mxu1 }
 0x287   : > { %v437_v38 = vadd.f32 %v647_v37, %v349_v35  ;;  %v431_v39 = vpop.f32.mrb[1].mxu1 }
 0x288   : > { %v432_v40 = vadd.f32 %v431_v39, %v348_v36 }
 0x289   : > { %v612_v42 = vmul.f32 -1.442695, %v437_v38 }
 0x28a   : > { %v611_v44 = vmul.f32 -1.442695, %v432_v40  ;;  %v650_v45 = vpop.f32.mrb[2].mxu1 }
 0x28b   : > { %713 = vpow2.f32 %v612_v42  ;;  %v447_v46 = vadd.f32 %v650_v45, %v351_v41  ;;  %v441_v47 = vpop.f32.mrb[3].mxu1 }
 0x28c   : > { %715 = vpow2.f32 %v611_v44  ;;  %v442_v48 = vadd.f32 %v441_v47, %v350_v43 }
 0x28d   : > { %v614_v49 = vmul.f32 -1.442695, %v447_v46 }
 0x28e   : > { %v613_v50 = vmul.f32 -1.442695, %v442_v48 }
 0x28f   : > { %717 = vpow2.f32 %v614_v49 }
 0x290   : > { %719 = vpow2.f32 %v613_v50 }
 0x295   : > { %v714_v51 = vpop.eup %713 }
 0x296   : > { %v716_v52 = vpop.eup %715  ;;  %v463_v53 = vadd.f32 1.0, %v714_v51 }
 0x297   : > { %v462_v54 = vadd.f32 1.0, %v716_v52 }
 0x298   : > { %721 = vrcp.f32 %v463_v53 }
 0x299   : > { %v718_v55 = vpop.eup %717  ;;  %723 = vrcp.f32 %v462_v54 }
 0x29a   : > { %v720_v56 = vpop.eup %719  ;;  %v465_v58 = vadd.f32 1.0, %v718_v55 }
 0x29b   : > { %v464_v57 = vadd.f32 1.0, %v720_v56 }
 0x29d   : > { %725 = vrcp.f32 %v464_v57 }
 0x29e   : > { %727 = vrcp.f32 %v465_v58 }
 0x2a2   : > { %v722_v59 = vpop.eup %721 }
 0x2a3   : > { %v724_v60 = vpop.eup %723  ;;  %481 = vperm.xlu1 %712, %v722_v59  }
 0x2a4   : > { %476 = vperm.xlu0 %711, %v724_v60  }
 0x2a7   : > { %v726_v61 = vpop.eup %725 }
 0x2a8   : > { %486 = vperm.xlu1 %712, %v726_v61   ;;  %v728_v62 = vpop.eup %727 }
 0x2ac   : > { %491 = vperm.xlu1 %712, %v728_v62  }
 0x322   : > { %v482_v63 = vpop.permute.xlu1 %481 }
 0x323   : > { %v496_v3 = vmul.f32 %v482_v63, %v997_v8  ;;  %v497_v7 = vmul.f32 %v482_v63, %v999_v9  ;;  %v477_v10 = vpop.permute.xlu0 %476 }
 0x324   : > { %v494_v11 = vmul.f32 %v477_v10, %v985_v2  ;;  %v495_v12 = vmul.f32 %v477_v10, %v989_v4 }
 0x325   : > { %504 = vst [vmem:[%s242_s7 + $0x10] sm:$0xff] %v496_v3  ;;  %505 = vst [vmem:[%s242_s7 + $0x18] sm:$0xff] %v497_v7 }
 0x326   : > { %502 = vst [vmem:[%s242_s7] sm:$0xff] %v494_v11  ;;  %503 = vst [vmem:[%s242_s7 + $0x8] sm:$0xff] %v495_v12 }
 0x327   : > { %v487_v13 = vpop.permute.xlu1 %486 }
 0x328   : > { %v498_v14 = vmul.f32 %v487_v13, %v981_v0  ;;  %v499_v8 = vmul.f32 %v487_v13, %v983_v1 }
 0x32a   : > { %506 = vst [vmem:[%s242_s7 + $0x20] sm:$0xff] %v498_v14  ;;  %507 = vst [vmem:[%s242_s7 + $0x28] sm:$0xff] %v499_v8 }
 0x32b   : > { %v492_v2 = vpop.permute.xlu1 %491 }
 0x32c   : > { %v500_v4 = vmul.f32 %v492_v2, %v991_v5  ;;  %v501_v0 = vmul.f32 %v492_v2, %v993_v6 }
 0x32e   : > { %508 = vst [vmem:[%s242_s7 + $0x30] sm:$0xff] %v500_v4  ;;  %509 = vst [vmem:[%s242_s7 + $0x38] sm:$0xff] %v501_v0 }
 0x32f   : > { %772 = shalt.err (!%p769_p2)
}
 0x330   : > { %s773_s12 = scalar_lea.hbm %s1049_s13, 1024  ;;  %s777_s16 = scalar_lea.hbm %s1100_s5, 2048 }
 0x331   : > { %p774_p4 = scmp.ne.s32.totalorder %s1049_s13, %s773_s12  ;;  %p778_p9 = scmp.lt.u32.totalorder %s1049_s13, %s1100_s5 }
 0x332   : > { %p779_p1 = scmp.lt.u32.totalorder %s777_s16, %s773_s12  ;;  %p781_p6 = scmp.lt.u32.totalorder %s773_s12, %s1049_s13 }
 0x333   : > { %p775_p5 = pnand %p774_p4, %p1107_p11 }
 0x334   : > { %p780_p3 = por %p779_p1, %p778_p9 }
 0x335   : > { %p776_p7 = pneg %p775_p5 }
 0x336   : > { %p782_p12 = por %p781_p6, %p780_p3 }
 0x338   : > { %p783_p13 = pnand %p782_p12, %p776_p7 }
 0x33a   : > { %786 = shalt.err (!%p783_p13)
}
 0x33b   : > { %s835_s10 = smov 256   ;;  %s836_s25 = smov 16  }
 0x33c   : > { %659 = dma.vmem_to_hbm [thread:$0]  (%p1107_p11), %s1044_s9, 1024, %s1049_s13, %s511_s22, %s835_s10, %s835_s10, %s836_s25  }
 0x33d PF: > { %s539_s11 = sand.u32 1, %s813_s18   ;;  %p1108_p8 = scmp.ne.s32.totalorder %s1105_s6, 0 }
 0x33e   : > { %p1109_p10 = scmp.ge.s32.totalorder %s825_s21, 2  ;;  %s540_s17 = scalar_lea.sflag [#allocation4], %s539_s11 }
 0x340   : > { %p666_p0 = pnand %p1109_p10, %p1108_p8 }
 0x342   : > { %808 = dma.done.wait (!%p666_p0), %s540_s17, 1024  }
 0x343   : > { %810 = vsyncadd (!%p666_p0), %s540_s17, 4294966272  ;;  %p18_p2 = scmp.ge.s32.totalorder %s892_s24, 4   ;;  %s1110_s18 = smov %s817_s19 }
 0x344   : > { %s1111_s19 = smov %s821_s20  ;;  %s1112_s20 = smov %s904_s27 }
 0x345   : > { %s1113_s21 = smov %s892_s24  ;;  %20 = sbr.rel (!%p18_p2) target bundleno = 5 (0x5), region = 85 }
 0x34c   :  { %545 = vsyncpa [#allocation3], 1 }
 0x34d   :  { %547 = vsyncpa [#allocation3 + $0x1], 1 }
 0x34e   :  { %548 = vsyncpa [#allocation4], 1 }
 0x34f   :  { %550 = vsyncpa [#allocation4 + $0x1], 1 }

</bundles_post_ra>
